<compile_context>
chip_gen: v7x
topology: tpu7x:2x2x1
jax: 0.10.0
libtpu: 0.0.40
codegen_flags: <defaults>
</compile_context>

<pallas_src>
import functools

import jax
import jax.numpy as jnp
from jax.experimental import pallas as pl
from jax.experimental.pallas import tpu as pltpu


def _round_up(a, b):
    return (a + b - 1) // b * b


def _choose_rows(n, target=512):
    """Return (N_pad, TM): padded per-image row count and the row-tile size."""
    n_pad = _round_up(n, 16)          # bf16 sublane alignment
    if n_pad <= target:
        return n_pad, n_pad           # one row-block per image
    # Largest divisor of n_pad that is a multiple of 16 and <= target.
    tm = max(d for d in range(16, target + 1, 16) if n_pad % d == 0)
    if tm < 128:
        # Divisors are all tiny (e.g. n_pad = 16 * prime): allow a little row
        # padding (<~6%) to get a reasonably sized tile instead.
        for cand in (512, 448, 384, 320, 256, 192, 128):
            padded = _round_up(n, cand)
            if padded - n <= max(32, n // 16):
                return padded, cand
    return n_pad, tm


def _patch_embed_kernel(p_ref, w_ref, add_ref, o_ref):
    # p_ref:   (1, TM, K_pad)  bf16  im2col patches for (image b, row-block n)
    # w_ref:   (K_pad, E_pad)  bf16  projection weight, resident (DMAed once)
    # add_ref: (TM, E_pad)     f32   pos_embedding + bias rows for block n;
    #                                n is the OUTER (slow) grid axis, so this
    #                                block is re-DMAed only when n changes.
    # o_ref:   (1, TM, E_pad)        output tile
    acc = jnp.dot(p_ref[0], w_ref[...], preferred_element_type=jnp.float32)
    o_ref[0] = (acc + add_ref[...]).astype(o_ref.dtype)


def prepare_patch_embed_params(weight, bias, pos_embedding, *, tm_target=512):
    """One-time parameter prep (hoisted out of the per-call forward).

    weight: (E, C, p, p), bias: (E,), pos_embedding: (1, N, E).
    Returns:
      w_kE:   (K_pad, E_pad) bf16, K order (c, ph, pw) matching the im2col.
      add_NE: (N_pad, E_pad) f32, pos_embedding + bias, zero padded.
    """
    E, C, ph, pw = weight.shape
    K = C * ph * pw
    N = pos_embedding.shape[1]
    K_pad = _round_up(K, 128)
    E_pad = _round_up(E, 128)
    N_pad, _ = _choose_rows(N, tm_target)

    w_kE = weight.reshape(E, K).T.astype(jnp.bfloat16)            # (K, E)
    w_kE = jnp.pad(w_kE, ((0, K_pad - K), (0, E_pad - E)))

    add_NE = pos_embedding.reshape(N, E).astype(jnp.float32) + bias[None, :]
    add_NE = jnp.pad(add_NE, ((0, N_pad - N), (0, E_pad - E)))
    return w_kE, add_NE


def patch_embed_apply(x, w_kE, add_NE, *, patch_size, embed_dim,
                      out_dtype=jnp.float32, tm_target=512):
    """x: (B, C, H, W) f32; w_kE/add_NE from prepare_patch_embed_params.
    Returns (B, N, embed_dim) in out_dtype."""
    B, C, H, W = x.shape
    p = patch_size
    Hp, Wp = H // p, W // p
    if (Hp * p, Wp * p) != (H, W):             # Conv2d-with-stride truncation
        x = x[:, :, :Hp * p, :Wp * p]
    N = Hp * Wp
    K = C * p * p
    K_pad, E_pad = w_kE.shape
    N_pad, TM = _choose_rows(N, tm_target)
    assert add_NE.shape == (N_pad, E_pad), (add_NE.shape, N_pad, E_pad)
    assert K_pad >= K and E_pad >= embed_dim
    nrb = N_pad // TM                          # row blocks per image

    # Host-side im2col, fused by XLA with the bf16 cast and padding:
    # (B,C,Hp,p,Wp,p) -> (B,Hp,Wp,C,p,p) -> (B,N,K); inner (c,ph,pw) order
    # matches the Conv2d weight flattening in prepare_patch_embed_params.
    patches = x.reshape(B, C, Hp, p, Wp, p)
    patches = patches.transpose(0, 2, 4, 1, 3, 5).reshape(B, N, K)
    patches = patches.astype(jnp.bfloat16)
    patches = jnp.pad(patches, ((0, 0), (0, N_pad - N), (0, K_pad - K)))

    # Rough VMEM need: double-buffered streams + the resident weight.
    # (pl.Buffered(1) on the resident weight would drop its second buffer,
    #  ~K_pad*E_pad*2 bytes; left at the default for robustness.)
    vmem_est = (2 * TM * K_pad * 2 + 2 * K_pad * E_pad * 2
                + 2 * TM * E_pad * 4 + 2 * TM * E_pad * 4)
    vmem_limit = int(max(32 << 20, min(2 * vmem_est, 56 << 20)))

    out = pl.pallas_call(
        _patch_embed_kernel,
        out_shape=jax.ShapeDtypeStruct((B, N_pad, E_pad), out_dtype),
        grid_spec=pltpu.PrefetchScalarGridSpec(
            num_scalar_prefetch=0,
            # Row-block axis outermost so the pos+bias block is reused across
            # the whole batch between DMAs; batch axis innermost.
            grid=(nrb, B),
            in_specs=[
                pl.BlockSpec((1, TM, K_pad), lambda n, b: (b, n, 0)),
                pl.BlockSpec((K_pad, E_pad), lambda n, b: (0, 0)),   # resident
                pl.BlockSpec((TM, E_pad), lambda n, b: (n, 0)),      # per-n
            ],
            out_specs=pl.BlockSpec((1, TM, E_pad), lambda n, b: (b, n, 0)),
        ),
        compiler_params=pltpu.CompilerParams(
            dimension_semantics=("parallel", "parallel"),
            vmem_limit_bytes=vmem_limit,
        ),
    )(patches, w_kE, add_NE)

    return out[:, :N, :embed_dim]


def patch_embed(x, weight, bias, pos_embedding, patch_size):
    """Convenience wrapper matching the PyTorch module's forward."""
    w_kE, add_NE = prepare_patch_embed_params(weight, bias, pos_embedding)
    return patch_embed_apply(x, w_kE, add_NE, patch_size=patch_size,
                             embed_dim=weight.shape[0])


if __name__ == "__main__":
    # Module config (small, consistent with the forward).
    img_size, patch_size, in_chans, embed_dim = 16, 4, 4, 32
    B = 2
    Hp = img_size // patch_size
    N = Hp * Hp
    K = in_chans * patch_size * patch_size

    key = jax.random.PRNGKey(0)
    kx, kw, kb, kp = jax.random.split(key, 4)

    x = jax.random.normal(kx, (B, in_chans, img_size, img_size), jnp.float32)
    weight = 0.05 * jax.random.normal(
        kw, (embed_dim, in_chans, patch_size, patch_size), jnp.float32)
    bias = 0.05 * jax.random.normal(kb, (embed_dim,), jnp.float32)
    pos_embedding = 0.05 * jax.random.normal(kp, (1, N, embed_dim), jnp.float32)

    # One-time parameter prep (hoisted out of the forward), then jitted apply.
    w_kE, add_NE = prepare_patch_embed_params(weight, bias, pos_embedding)
    fn = jax.jit(functools.partial(
        patch_embed_apply, patch_size=patch_size, embed_dim=embed_dim))
    out = jax.block_until_ready(fn(x, w_kE, add_NE))

    # Pure-JAX f32 reference of the same math (conv as strided patch matmul).
    patches_ref = x.reshape(B, in_chans, Hp, patch_size, Hp, patch_size)
    patches_ref = patches_ref.transpose(0, 2, 4, 1, 3, 5).reshape(B, N, K)
    ref = patches_ref @ weight.reshape(embed_dim, K).T + bias[None, None, :]
    ref = ref + pos_embedding

    assert out.shape == (B, N, embed_dim)
    # bf16 inputs with f32 accumulation -> slightly looser tolerance vs f32 ref.
    assert jnp.allclose(out, ref, atol=2e-2, rtol=2e-2), float(
        jnp.max(jnp.abs(out - ref)))
    print("KERNEL_OK")
</pallas_src>

<mosaic_0001>
module attributes {stable_mosaic.version = 11 : i64} {
  func.func @_patch_embed_kernel(%arg0: i32, %arg1: i32, %arg2: memref<1x16x128xbf16, #tpu.memory_space<vmem>>, %arg3: memref<128x128xbf16, #tpu.memory_space<vmem>>, %arg4: memref<16x128xf32, #tpu.memory_space<vmem>>, %arg5: memref<1x16x128xf32, #tpu.memory_space<vmem>>) attributes {dimension_semantics = [#tpu.dimension_semantics<parallel>, #tpu.dimension_semantics<parallel>], iteration_bounds = array<i64: 1, 2>, scalar_prefetch = 0 : i64, scratch_operands = 0 : i64, tpu.core_type = #tpu.core_type<tc>, window_params = [{transform_indices = @transform_0, window_bounds = array<i64: 1, 16, 128>}, {pipeline_mode = #tpu.pipeline_mode<synchronous>, transform_indices = @transform_1, window_bounds = array<i64: 128, 128>}, {transform_indices = @transform_2, window_bounds = array<i64: 16, 128>}, {transform_indices = @transform_3, window_bounds = array<i64: 1, 16, 128>}]} {
    %c0 = arith.constant 0 : index
    %c0_0 = arith.constant 0 : index
    %c0_1 = arith.constant 0 : index
    %0 = vector.load %arg2[%c0, %c0_0, %c0_1] : memref<1x16x128xbf16, #tpu.memory_space<vmem>>, vector<1x16x128xbf16>
    %1 = vector.shape_cast %0 : vector<1x16x128xbf16> to vector<16x128xbf16>
    %c0_2 = arith.constant 0 : index
    %c0_3 = arith.constant 0 : index
    %2 = vector.load %arg3[%c0_2, %c0_3] : memref<128x128xbf16, #tpu.memory_space<vmem>>, vector<128x128xbf16>
    %cst = arith.constant dense<0.000000e+00> : vector<16x128xf32>
    %3 = tpu.matmul %1, %2, %cst {dimension_numbers = #tpu.dot_dimension_numbers<[1], [0], [0], [1], [0, 0, 1, 1], [], []>} : vector<16x128xbf16>, vector<128x128xbf16>, vector<16x128xf32> -> vector<16x128xf32>
    %c0_4 = arith.constant 0 : index
    %c0_5 = arith.constant 0 : index
    %4 = vector.load %arg4[%c0_4, %c0_5] : memref<16x128xf32, #tpu.memory_space<vmem>>, vector<16x128xf32>
    %5 = arith.addf %3, %4 : vector<16x128xf32>
    %c0_6 = arith.constant 0 : index
    %c0_7 = arith.constant 0 : index
    %c0_8 = arith.constant 0 : index
    %6 = vector.load %arg5[%c0_6, %c0_7, %c0_8] : memref<1x16x128xf32, #tpu.memory_space<vmem>>, vector<1x16x128xf32>
    %7 = vector.shape_cast %6 : vector<1x16x128xf32> to vector<16x128xf32>
    %8 = vector.shape_cast %5 : vector<16x128xf32> to vector<1x16x128xf32>
    tpu.vector_store %arg5[%c0_6, %c0_7, %c0_8], %8 {strides = array<i32>} : memref<1x16x128xf32, #tpu.memory_space<vmem>>, vector<1x16x128xf32>,
    return
  }
  func.func @transform_0(%arg0: i32, %arg1: i32) -> (i32, i32, i32) {
    %c0_i32 = arith.constant 0 : i32
    %c0_i32_0 = arith.constant 0 : i32
    return %arg1, %arg0, %c0_i32 : i32, i32, i32
  }
  func.func @transform_1(%arg0: i32, %arg1: i32) -> (i32, i32) {
    %c0_i32 = arith.constant 0 : i32
    %c0_i32_0 = arith.constant 0 : i32
    %c0_i32_1 = arith.constant 0 : i32
    return %c0_i32, %c0_i32_0 : i32, i32
  }
  func.func @transform_2(%arg0: i32, %arg1: i32) -> (i32, i32) {
    %c0_i32 = arith.constant 0 : i32
    %c0_i32_0 = arith.constant 0 : i32
    return %arg0, %c0_i32 : i32, i32
  }
  func.func @transform_3(%arg0: i32, %arg1: i32) -> (i32, i32, i32) {
    %c0_i32 = arith.constant 0 : i32
    %c0_i32_0 = arith.constant 0 : i32
    return %arg1, %arg0, %c0_i32 : i32, i32, i32
  }
}

</mosaic_0001>

<bundles_post_ra>
// kernel: patch_embed_apply.1
= control target key start
LH: loop header
LB: loop body
LE: loop exit
PB: predicated region body
PF: predicated region fallthrough
CT: control target
= control target key end

     0   :  { %8 = vsyncpa [#allocation3], 0  ;;  %s822_s0 = inlined_call_operand.vmem [shape: bf16[2,16,128], index: 0, kind: input, shape index: {}]   ;;  %s823_s1 = inlined_call_operand.vmem [shape: bf16[128,128], index: 1, kind: input, shape index: {}]   ;;  %s824_s2 = inlined_call_operand.vmem [shape: f32[16,128], index: 2, kind: input, shape index: {}]   ;;  %s825_s3 = inlined_call_operand.hbm [shape: f32[2,16,128], index: 3, kind: output, shape index: {}]  }
   0x1   :  { %10 = vsyncpa [#allocation3 + $0x1], 0  ;;  %s677_s12 = smov 0   ;;  %s679_s13 = smov 0  }
   0x2   :  { %s681_s14 = smov 0   ;;  %s683_s15 = smov 0  }
   0x3   :  { %s685_s16 = smov 0   ;;  %s687_s17 = smov 0  }
   0x4 LB: > { %s450_s18 = sadd.s32 4294967295, %s650_s17   ;;  %s451_s19 = sadd.s32 4294967294, %s650_s17   ;;  %s650_s17 = sphi %s687_s17, %s16_s17   ;;  %s646_s16 = sphi %s685_s16, %s832_s16   ;;  %s642_s15 = sphi %s683_s15, %s831_s15   ;;  %s638_s14 = sphi %s681_s14, %s830_s14   ;;  %s634_s13 = sphi %s679_s13, %s829_s13   ;;  %s630_s12 = sphi %s677_s12, %s828_s12  }
   0x5   : > { %s25_s20 = sadd.s32 1, %s646_s16  ;;  %s112_s21 = sadd.s32 1, %s638_s14 }
   0x6   : > { %p26_p0 = scmp.ge.s32.totalorder %s25_s20, 2  ;;  %p122_p1 = scmp.ne.s32.totalorder %s638_s14, %s634_s13 }
   0x7   : > { %p123_p2 = scmp.eq.s32.totalorder %s450_s18, 1  ;;  %p128_p3 = scmp.ne.s32.totalorder %s634_s13, %s630_s12 }
   0x8   : > { %s834_s20 = smov (%p26_p0, %s25_s20), 0  ;;  %p129_p5 = scmp.eq.s32.totalorder %s451_s19, 1 }
   0x9   : > { %p717_p4 = por %p123_p2, %p122_p1  ;;  %s107_s23 = ssub.s32 %s646_s16, %s834_s20 }
   0xa   : > { %p455_p6 = scmp.ge.s32.totalorder %s650_s17, 1  ;;  %p110_p7 = scmp.eq.s32.totalorder %s107_s23, 0 }
   0xb   : > { %p724_p8 = por %p129_p5, %p128_p3  ;;  %p172_p9 = scmp.lt.s32.totalorder %s650_s17, 3 }
   0xc   : > { %s730_s25 = scalar_select %p110_p7, %s638_s14, %s112_s21  }
   0xd   : > { %p173_p10 = pnand %p455_p6, %p172_p9 }
   0xe   : > { %v563_v0 = vld [vmem:[%s823_s1] sm:$0xff] (!%p173_p10)   ;;  %v652_v1 = vmov (!%p173_p10), 0.0   ;;  %v564_v2 = vld [vmem:[%s823_s1 + $0x8] sm:$0xff] (!%p173_p10)   ;;  %vm653_vm0 = vmmov (!%p173_p10), 0   ;;  %p206_p11 = scmp.lt.s32.totalorder (!%p173_p10), %s642_s15, 1  ;;  %v565_v3 = vld [vmem:[%s823_s1 + $0x10] sm:$0xff] (!%p173_p10)  }
   0xf   : > { %176 = sbr.rel (%p173_p10) target bundleno = 278 (0x116), region = 32  ;;  %484 = vmatprep.subr.bf16.mxu0 (!%p173_p10), %v652_v1  ;;  %500 = vmatprep.mubr.msk.bf16.mxu0 (!%p173_p10), %vm653_vm0, %v652_v1  ;;  %v566_v4 = vld [vmem:[%s823_s1 + $0x18] sm:$0xff] (!%p173_p10)   ;;  %v567_v5 = vld [vmem:[%s823_s1 + $0x20] sm:$0xff] (!%p173_p10)   ;;  %v568_v6 = vld [vmem:[%s823_s1 + $0x28] sm:$0xff] (!%p173_p10)   ;;  %s474_s10 = sshll.u32 (!%p173_p10), %s642_s15, 8 }
  0x10   : > { %485 = vmatpush3.bf16.msra.mxu0 (!%p173_p10), %v563_v0  ;;  %v569_v7 = vld [vmem:[%s823_s1 + $0x30] sm:$0xff] (!%p173_p10)   ;;  %v570_v8 = vld [vmem:[%s823_s1 + $0x38] sm:$0xff] (!%p173_p10)   ;;  %v241_v10 = vld [vmem:[%s824_s2] sm:$0xff] (!%p173_p10)  ;;  %s774_s21 = scalar_lea.hbm (!%p173_p10), %s825_s3, %s474_s10  ;;  %s654_s26 = smov (!%p173_p10), [#allocation2]  }
  0x11   : > { %486 = vmatprep.subr.bf16.mxu0 (!%p173_p10), %v652_v1  ;;  %v242_v12 = vld [vmem:[%s824_s2 + $0x8] sm:$0xff] (!%p173_p10)  ;;  %s576_s27 = sshll.u32 (!%p173_p10), %s654_s26, 4  ;;  %s577_s27 = int_to_ptr.vmem [resolvable:$false] %s576_s27 }
  0x12   : > { %s578_s28 = scalar_lea.vmem (!%p173_p10), %s577_s27, 512 }
  0x14   : > { %487 = vmatpush3.bf16.msra.mxu0 (!%p173_p10), %v564_v2 }
  0x15   : > { %488 = vmatprep.subr.bf16.mxu0 (!%p173_p10), %v652_v1 }
  0x16   : > { %s207_s30 = scalar_select %p206_p11, %s642_s15, 1 }
  0x18   : > { %s473_s6 = sshll.u32 %s207_s30, 3  ;;  %489 = vmatpush3.bf16.msra.mxu0 %v565_v3  ;;  %s202_s30 = sand.u32 1, %s634_s13  }
  0x19   : > { %s213_s9 = scalar_lea.vmem %s822_s0, %s473_s6  ;;  %490 = vmatprep.subr.bf16.mxu0 %v652_v1  ;;  %s456_s4 = sshll.u32 %s202_s30, 4 }
  0x1a   : > { %v571_v9 = vld [vmem:[%s213_s9] sm:$0xff]   ;;  %s204_s7 = scalar_lea.vmem [#allocation2], %s456_s4  ;;  %s776_s15 = scalar_lea.sflag [#allocation3], %s202_s30 }
  0x1b   : > { %s356_s8 = sshll.u32 %s204_s7, 4  ;;  %s769_s8 = int_to_ptr.vmem [resolvable:$true] %s356_s8 }
  0x1c   : > { %491 = vmatpush3.bf16.msra.mxu0 %v566_v4  ;;  %s572_s23 = scalar_lea.vmem %s769_s8, 256  ;;  %p579_p1 = scmp.lt.s32.totalorder %s769_s8, %s577_s27 }
  0x1d   : > { %492 = vmatprep.subr.bf16.mxu0 %v652_v1  ;;  %p573_p12 = scmp.ne.s32.totalorder %s769_s8, %s572_s23  ;;  %p580_p2 = scmp.lt.s32.totalorder %s578_s28, %s572_s23 }
  0x1f   : > { %p574_p13 = pnand %p573_p12, %p717_p4  ;;  %p581_p3 = por %p580_p2, %p579_p1 }
  0x20   : > { %493 = vmatpush3.bf16.msra.mxu0 %v567_v5 }
  0x21   : > { %494 = vmatprep.subr.bf16.mxu0 %v652_v1  ;;  %p575_p0 = pneg %p574_p13 }
  0x23   : > { %p582_p5 = pnand %p581_p3, %p575_p0 }
  0x24   : > { %495 = vmatpush3.bf16.msra.mxu0 %v568_v6 }
  0x25   : > { %496 = vmatprep.subr.bf16.mxu0 %v652_v1 }
  0x28   : > { %497 = vmatpush3.bf16.msra.mxu0 %v569_v7 }
  0x29   : > { %498 = vmatprep.subr.bf16.mxu0 %v652_v1 }
  0x2c   : > { %499 = vmatpush3.bf16.msra.mxu0 %v570_v8 }
  0x2f   : > { %501 = vmatmul.mubr.bf16.vlgmr.msra.gmra.mrb[0].mxu0 %v571_v9 }
 0x102   : > { %v331_v11 = vpop.f32.mrb[0].mxu0 }
 0x103   : > { %v332_v13 = vadd.f32 %v331_v11, %v241_v10  ;;  %v502_v14 = vpop.f32.mrb[1].mxu0 }
 0x104   : > { %v334_v15 = vpop.f32.mrb[2].mxu0 }
 0x105   : > { %338 = vst [vmem:[%s204_s7] sm:$0xff] %v332_v13  ;;  %v335_v16 = vadd.f32 %v334_v15, %v242_v12  ;;  %v503_v17 = vpop.f32.mrb[3].mxu0 }
 0x107   : > { %339 = vst [vmem:[%s204_s7 + $0x8] sm:$0xff] %v335_v16 }
 0x108   : > { %585 = shalt.err (!%p582_p5)
}
 0x109   : > { %s586_s29 = scalar_lea.hbm %s774_s21, 256  ;;  %s590_s5 = scalar_lea.hbm %s825_s3, 512 }
 0x10a   : > { %p587_p6 = scmp.ne.s32.totalorder %s774_s21, %s586_s29  ;;  %p591_p10 = scmp.lt.u32.totalorder %s774_s21, %s825_s3 }
 0x10b   : > { %p592_p11 = scmp.lt.u32.totalorder %s590_s5, %s586_s29  ;;  %p594_p13 = scmp.lt.u32.totalorder %s586_s29, %s774_s21 }
 0x10c   : > { %p588_p7 = pnand %p587_p6, %p717_p4 }
 0x10d   : > { %p593_p12 = por %p592_p11, %p591_p10 }
 0x10e   : > { %p589_p9 = pneg %p588_p7 }
 0x10f   : > { %p595_p0 = por %p594_p13, %p593_p12 }
 0x111   : > { %p596_p1 = pnand %p595_p0, %p589_p9 }
 0x113   : > { %599 = shalt.err (!%p596_p1)
}
 0x114   : > { %s655_s10 = smov 128   ;;  %s656_s11 = smov 8  }
 0x115   : > { %504 = dma.vmem_to_hbm [thread:$0]  (%p717_p4), %s769_s8, 256, %s774_s21, %s776_s15, %s655_s10, %s655_s10, %s656_s11  }
 0x116 PF: > { %p510_p2 = scmp.ge.s32.totalorder %s650_s17, 2  ;;  %s371_s18 = sand.u32 1, %s630_s12  }
 0x117   : > { %s372_s9 = scalar_lea.sflag [#allocation3], %s371_s18 }
 0x118   : > { %p507_p3 = pnand %p510_p2, %p724_p8 }
 0x11a   : > { %625 = dma.done.wait (!%p507_p3), %s372_s9, 256  }
 0x11b   : > { %627 = vsyncadd (!%p507_p3), %s372_s9, 4294967040  ;;  %s16_s17 = sadd.s32 1, %s650_s17   ;;  %s828_s12 = smov %s634_s13 }
 0x11c   : > { %p13_p5 = scmp.ge.s32.totalorder %s16_s17, 4   ;;  %s829_s13 = smov %s638_s14 }
 0x11d   : > { %s830_s14 = smov %s730_s25  ;;  %s831_s15 = smov %s646_s16 }
 0x11e   : > { %s832_s16 = smov %s834_s20  ;;  %15 = sbr.rel (!%p13_p5) target bundleno = 4 (0x4), region = 70 }
 0x125   :  { %377 = vsyncpa [#allocation3], 1 }
 0x126   :  { %379 = vsyncpa [#allocation3 + $0x1], 1 }

</bundles_post_ra>
